<compile_context>
chip_gen: v5e
topology: v5e:2x2
jax: 0.10.0
libtpu: 0.0.40
codegen_flags: <defaults>
</compile_context>

<pallas_src>
import jax
import jax.numpy as jnp
from jax.experimental import pallas as pl
from jax.experimental.pallas import tpu as pltpu


def _alpha_kernel(log_alpha_ref, out_ref):
    # log_alpha_ref: SMEM (1,) f32 -> scalar read on the scalar path (no
    # padded vector DMA).  Broadcast to a single (1,1) f32 vreg and take exp
    # on the EUP; write the (1,1) tile back.
    log_alpha = log_alpha_ref[0]
    out_ref[...] = jnp.exp(jnp.full((1, 1), log_alpha, dtype=jnp.float32))


def _alpha_pallas(log_alpha_val: jax.Array) -> jax.Array:
    """exp(log_alpha_val) via a minimal, grid-less Pallas kernel."""
    # Scalar parameter staged as a (1,) SMEM input.
    log_alpha_1d = jnp.reshape(
        jnp.asarray(log_alpha_val, dtype=jnp.float32), (1,)
    )

    out_2d = pl.pallas_call(
        _alpha_kernel,
        out_shape=jax.ShapeDtypeStruct((1, 1), jnp.float32),
        in_specs=[pl.BlockSpec(memory_space=pltpu.SMEM)],
        out_specs=pl.BlockSpec(memory_space=pltpu.VMEM),
    )(log_alpha_1d)

    # Match torch.exp(self.log_alpha_val): a 0-d float32 value.
    return jnp.reshape(out_2d, ())


@jax.custom_vjp
def alpha_forward(log_alpha_val: jax.Array) -> jax.Array:
    """Equivalent of Alpha.forward(): exp(log_alpha_val) as a 0-d f32.

    Differentiable w.r.t. log_alpha_val (it is a trainable parameter in the
    PyTorch module); the VJP is defined below without touching Pallas.
    """
    return _alpha_pallas(log_alpha_val)


def _alpha_fwd(log_alpha_val):
    alpha = _alpha_pallas(log_alpha_val)
    # Residual is the forward value itself: d exp(x)/dx = exp(x).
    return alpha, alpha


def _alpha_bwd(alpha, g):
    return (g * alpha,)


alpha_forward.defvjp(_alpha_fwd, _alpha_bwd)


if __name__ == "__main__":
    # Deterministic parameter init, matching nn.Parameter(torch.tensor(1.0)).
    # (PRNGKey only used to demonstrate determinism plumbing; param is fixed.)
    _ = jax.random.PRNGKey(0)
    log_alpha_val = jnp.asarray(1.0, dtype=jnp.float32)

    alpha = alpha_forward(log_alpha_val)
    alpha = jax.block_until_ready(alpha)

    expected = jnp.exp(jnp.float32(1.0))
    assert alpha.shape == ()
    assert alpha.dtype == jnp.float32
    assert jnp.allclose(alpha, expected, rtol=1e-6, atol=1e-6)

    # Trainability check (review correctness concern): grad of exp(x) at x=1.
    grad = jax.block_until_ready(jax.grad(alpha_forward)(log_alpha_val))
    assert jnp.allclose(grad, expected, rtol=1e-6, atol=1e-6)

    print("KERNEL_OK")
</pallas_src>

<mosaic_0001>
module attributes {stable_mosaic.version = 11 : i64} {
  func.func @_alpha_kernel(%arg0: memref<1xf32, #tpu.memory_space<smem>>, %arg1: memref<1x1xf32, #tpu.memory_space<vmem>>) attributes {dimension_semantics = [], scalar_prefetch = 0 : i64, scratch_operands = 0 : i64, tpu.core_type = #tpu.core_type<tc>} {
    %c0 = arith.constant 0 : index
    %0 = memref.load %arg0[%c0] : memref<1xf32, #tpu.memory_space<smem>>
    %1 = vector.broadcast %0 : f32 to vector<1x1xf32>
    %2 = math.exp %1 : vector<1x1xf32>
    %c0_0 = arith.constant 0 : index
    %c0_1 = arith.constant 0 : index
    %3 = vector.load %arg1[%c0_0, %c0_1] : memref<1x1xf32, #tpu.memory_space<vmem>>, vector<1x1xf32>
    tpu.vector_store %arg1[%c0_0, %c0_1], %2 {strides = array<i32>} : memref<1x1xf32, #tpu.memory_space<vmem>>, vector<1x1xf32>,
    return
  }
}

</mosaic_0001>

<bundles_post_ra>
// kernel: tpu_custom_call.1
= control target key start
LH: loop header
LB: loop body
LE: loop exit
PB: predicated region body
PF: predicated region fallthrough
CT: control target
= control target key end

     0   :  { %s78_s0 = inlined_call_operand.<no memory space> [shape: f32[1], index: 0, kind: input, shape index: {}]   ;;  %s79_s1 = inlined_call_operand.hbm [shape: f32[1,1], index: 1, kind: output, shape index: {}]  }
   0x1   :  { %v11_v0 = vstv %s78_s0 }
   0x2   :  { %7 = vsyncpa [#allocation4], 0  ;;  %v12_v1 = vmul.f32 1.442695, %v11_v0  ;;  %s61_s8 = smov [#allocation3]   ;;  %s23_s12 = sshll.u32 %s79_s1, 4  ;;  %s24_s12 = int_to_ptr.hbm [resolvable:$true] %s23_s12 }
   0x3   :  { %s21_s9 = sshll.u32 %s61_s8, 4  ;;  %vm14_vm0 = vcmask 0   ;;  %s22_s9 = int_to_ptr.vmem [resolvable:$true] %s21_s9 }
   0x4   :  { %33 = vpow2.f32 %v12_v1 }
   0xa   :  { %v34_v2 = vpop.eup %33 }
   0xb   :  { %15 = vst.msk [vmem:[#allocation3] sm:$0x1] %vm14_vm0, %v34_v2 }
   0xc   :  { %26 = dma.vmem_to_hbm [thread:$0]  %s22_s9, 16, %s24_s12, [#allocation4]  }
   0xd   :  { %59 = dma.done.wait [#allocation4], 16  }
   0xe   :  { %60 = vsyncadd [#allocation4], 4294967280 }
   0xf   :  { %31 = vsyncpa [#allocation4], 1 }

</bundles_post_ra>
